<compile_context>
chip_gen: v6e
topology: v6e:2x2x1
jax: 0.10.0
libtpu: 0.0.40
codegen_flags: <defaults>
</compile_context>

<pallas_src>
import jax
import jax.numpy as jnp
from jax.experimental import pallas as pl
from jax.experimental.pallas import tpu as pltpu


def _vmem_budget():
    """Returns (vmem_limit_bytes, per-array block byte cap), generation aware."""
    try:
        info = pltpu.get_tpu_info()
        cap = int(getattr(info, "vmem_capacity_bytes", 64 << 20))
        if cap <= 0:
            cap = 64 << 20
    except Exception:
        cap = 64 << 20  # conservative default (v7x physical per-TC VMEM)
    # Leave ~10 MiB headroom for compiler-internal scratch / double buffers:
    # v5e/v6e land at ~112 MiB, v7x at ~54 MiB.
    limit = max(16 << 20, min(cap - (10 << 20), 112 << 20))
    # Per-array block cap (each streamed in/out block is double buffered).
    blk_cap = max(1 << 20, min(limit // 6, 20 << 20))
    return limit, blk_cap


def _sublane_quantum(itemsize):
    # f32 -> 8, bf16 -> 16, int8/fp8 -> 32 (sublane packing).
    return max(8, 32 // int(itemsize))


def _pick_batch_group(B, per_batch_cost, limit, per_batch_blk, blk_cap, max_bt=16):
    """Largest divisor of B (capped) whose grouped block fits the budget."""
    bt = 1
    for d in range(1, min(B, max_bt) + 1):
        if B % d:
            continue
        if d * per_batch_cost + (2 << 20) <= limit and d * per_batch_blk <= blk_cap:
            bt = d
    return bt


def _pick_c_tile(C, HW, itemsize, blk_cap, q):
    """Largest multiple of q dividing C whose (c_tile, HW) block fits blk_cap."""
    if C <= q or C % q != 0:
        return C
    best = q
    for c_t in range(q, C + 1, q):
        if C % c_t == 0 and c_t * HW * itemsize <= blk_cap:
            best = c_t
    return best


# ---------------------------------------------------------------------------
# Fused path: squeeze + excite + scale in a single pass over x.
# ---------------------------------------------------------------------------
def _make_fused_kernel(inv_hw, bt):
    def kernel(x_ref, w1t_ref, w2_ref, o_ref):
        # x_ref: (bt, C, HW); w1t_ref / w2_ref: (C, c_r); o_ref: (bt, C, HW)
        total = jnp.sum(x_ref[...].astype(jnp.float32), axis=2, keepdims=True)
        mean = total * inv_hw                                   # (bt, C, 1)
        w1t = w1t_ref[...]                                      # (C, c_r)
        w2 = w2_ref[...]                                        # (C, c_r)
        # Tiny excitation MLP per batch element, unrolled over the (small,
        # static) bt using proven 2-D VPU broadcast + reduce patterns.
        scales = []
        for i in range(bt):
            m_i = mean[i]                                       # (C, 1)
            h_i = jnp.maximum(
                jnp.sum(w1t * m_i, axis=0, keepdims=True), 0.0)  # (1, c_r)
            s_i = jax.nn.sigmoid(
                jnp.sum(w2 * h_i, axis=1, keepdims=True))        # (C, 1)
            scales.append(s_i)
        s = jnp.stack(scales, axis=0)                            # (bt, C, 1)
        # Scale from the same resident block: single read + write of x.
        o_ref[...] = x_ref[...] * s.astype(o_ref.dtype)

    return kernel


# ---------------------------------------------------------------------------
# Fallback path (per-batch slab does not fit VMEM): two channel-tiled passes.
# ---------------------------------------------------------------------------
def _make_mean_kernel(inv_hw):
    def kernel(x_ref, m_ref):
        # x_ref: (c_tile, HW) -> per-channel spatial mean (c_tile, 1) in f32.
        m_ref[...] = (
            jnp.sum(x_ref[...].astype(jnp.float32), axis=1, keepdims=True)
            * inv_hw)

    return kernel


def _scale_kernel(x_ref, s_ref, o_ref):
    # s is already in x.dtype: a single broadcast multiply per tile.
    o_ref[...] = x_ref[...] * s_ref[...]


def se_block(x_nchw, w1, w2, *, force_two_pass=False):
    """SEBlock forward. x_nchw: (B, C, H, W); w1: (c//r, c); w2: (c, c//r)."""
    B, C, H, W = x_nchw.shape
    HW = H * W
    c_r = w1.shape[0]
    x = x_nchw.reshape(B, C, HW)
    itemsize = jnp.dtype(x.dtype).itemsize
    inv_hw = 1.0 / float(HW)

    limit, blk_cap = _vmem_budget()

    slab_in = C * HW * itemsize          # one batch element of x (= one of out)
    slab_f32 = C * HW * 4                # in-kernel f32 working copy
    per_batch_cost = 4 * slab_in + slab_f32   # 2x-buffered in + out, + f32 temp
    use_fused = (not force_two_pass) and (per_batch_cost + (2 << 20) <= limit)

    if use_fused:
        bt = _pick_batch_group(B, per_batch_cost, limit, slab_in, blk_cap)
        w1t = jnp.transpose(w1).astype(jnp.float32)   # (C, c_r)
        w2f = w2.astype(jnp.float32)                  # (C, c_r)
        out = pl.pallas_call(
            _make_fused_kernel(inv_hw, bt),
            out_shape=jax.ShapeDtypeStruct((B, C, HW), x.dtype),
            grid_spec=pltpu.PrefetchScalarGridSpec(
                num_scalar_prefetch=0,
                grid=(B // bt,),
                in_specs=[
                    pl.BlockSpec((bt, C, HW), lambda g: (g, 0, 0)),
                    pl.BlockSpec((C, c_r), lambda g: (0, 0)),
                    pl.BlockSpec((C, c_r), lambda g: (0, 0)),
                ],
                out_specs=pl.BlockSpec((bt, C, HW), lambda g: (g, 0, 0)),
            ),
            compiler_params=pltpu.CompilerParams(
                dimension_semantics=("parallel",),
                vmem_limit_bytes=limit,
            ),
        )(x, w1t, w2f)
        return out.reshape(B, C, H, W)

    # ---- Fallback: channel-tiled two-pass (full-HW lane-dense blocks, no pad).
    q = _sublane_quantum(itemsize)
    c_tile = _pick_c_tile(C, HW, itemsize, blk_cap, q)
    grid = (B, C // c_tile)

    means = pl.pallas_call(
        _make_mean_kernel(inv_hw),
        out_shape=jax.ShapeDtypeStruct((B, C, 1), jnp.float32),
        grid_spec=pltpu.PrefetchScalarGridSpec(
            num_scalar_prefetch=0,
            grid=grid,
            in_specs=[pl.BlockSpec((pl.Squeezed(), c_tile, HW),
                                   lambda b, c: (b, c, 0))],
            out_specs=pl.BlockSpec((pl.Squeezed(), c_tile, 1),
                                   lambda b, c: (b, c, 0)),
        ),
        compiler_params=pltpu.CompilerParams(
            dimension_semantics=("parallel", "parallel"),
            vmem_limit_bytes=limit,
        ),
    )(x)

    # Tiny excitation MLP on (B, C) means in plain JAX: negligible HBM traffic.
    mean_bc = means[:, :, 0]                                        # (B, C) f32
    h = jnp.maximum(mean_bc @ w1.T.astype(jnp.float32), 0.0)        # (B, c_r)
    s = jax.nn.sigmoid(h @ w2.T.astype(jnp.float32))                # (B, C)
    s = s.astype(x.dtype)[:, :, None]                               # (B, C, 1)

    out = pl.pallas_call(
        _scale_kernel,
        out_shape=jax.ShapeDtypeStruct((B, C, HW), x.dtype),
        grid_spec=pltpu.PrefetchScalarGridSpec(
            num_scalar_prefetch=0,
            grid=grid,
            in_specs=[
                pl.BlockSpec((pl.Squeezed(), c_tile, HW), lambda b, c: (b, c, 0)),
                pl.BlockSpec((pl.Squeezed(), c_tile, 1), lambda b, c: (b, c, 0)),
            ],
            out_specs=pl.BlockSpec((pl.Squeezed(), c_tile, HW),
                                   lambda b, c: (b, c, 0)),
        ),
        compiler_params=pltpu.CompilerParams(
            dimension_semantics=("parallel", "parallel"),
            vmem_limit_bytes=limit,
        ),
    )(x, s)
    return out.reshape(B, C, H, W)


def se_block_ref(x_nchw, w1, w2):
    """Pure-JAX reference mirroring the PyTorch forward."""
    se = jnp.mean(x_nchw.astype(jnp.float32), axis=(2, 3))            # (B, C)
    h = jnp.maximum(se @ w1.T.astype(jnp.float32), 0.0)               # (B, c//r)
    s = jax.nn.sigmoid(h @ w2.T.astype(jnp.float32))                  # (B, C)
    return x_nchw * s[:, :, None, None].astype(x_nchw.dtype)


if __name__ == "__main__":
    # Main config: B=2, C=32, r=16 (c//r = 2), 16x16 spatial (fused path,
    # both batch elements packed into a single block).
    B, C, H, W = 2, 32, 16, 16
    r = 16
    c_r = C // r

    key = jax.random.PRNGKey(0)
    kx, k1, k2 = jax.random.split(key, 3)

    x = jax.random.normal(kx, (B, C, H, W), dtype=jnp.float32)
    # PyTorch Linear layout: (out_features, in_features), no bias.
    w1 = jax.random.normal(k1, (c_r, C), dtype=jnp.float32) * (1.0 / jnp.sqrt(C))
    w2 = jax.random.normal(k2, (C, c_r), dtype=jnp.float32) * (1.0 / jnp.sqrt(c_r))

    out = jax.block_until_ready(se_block(x, w1, w2))
    ref = se_block_ref(x, w1, w2)
    assert out.shape == (B, C, H, W)
    assert jnp.allclose(out, ref, atol=1e-5, rtol=1e-5), "mismatch vs reference"

    # Ragged spatial size (9x9 = 81): fused path handles it with full-dim
    # blocks -- no padding and no output slice.
    B2, C2, H2, W2, r2 = 1, 16, 9, 9, 4
    x2 = jax.random.normal(kx, (B2, C2, H2, W2), dtype=jnp.float32)
    w1b = jax.random.normal(k1, (C2 // r2, C2), dtype=jnp.float32) * (1.0 / jnp.sqrt(C2))
    w2b = jax.random.normal(k2, (C2, C2 // r2), dtype=jnp.float32) * (1.0 / jnp.sqrt(C2 // r2))
    out2 = jax.block_until_ready(se_block(x2, w1b, w2b))
    assert jnp.allclose(out2, se_block_ref(x2, w1b, w2b), atol=1e-5, rtol=1e-5), \
        "mismatch vs reference (ragged spatial)"

    # Exercise the channel-tiled two-pass fallback (used when the per-batch
    # slab does not fit VMEM) end-to-end on the small config.
    out3 = jax.block_until_ready(se_block(x, w1, w2, force_two_pass=True))
    assert jnp.allclose(out3, ref, atol=1e-5, rtol=1e-5), \
        "mismatch vs reference (two-pass fallback)"

    print("KERNEL_OK")
</pallas_src>

<mosaic_0001>
module attributes {stable_mosaic.version = 11 : i64} {
  func.func @kernel(%arg0: i32, %arg1: memref<2x32x256xf32, #tpu.memory_space<vmem>>, %arg2: memref<32x2xf32, #tpu.memory_space<vmem>>, %arg3: memref<32x2xf32, #tpu.memory_space<vmem>>, %arg4: memref<2x32x256xf32, #tpu.memory_space<vmem>>) attributes {dimension_semantics = [#tpu.dimension_semantics<parallel>], iteration_bounds = array<i64: 1>, scalar_prefetch = 0 : i64, scratch_operands = 0 : i64, tpu.core_type = #tpu.core_type<tc>, window_params = [{transform_indices = @transform_0, window_bounds = array<i64: 2, 32, 256>}, {pipeline_mode = #tpu.pipeline_mode<synchronous>, transform_indices = @transform_1, window_bounds = array<i64: 32, 2>}, {pipeline_mode = #tpu.pipeline_mode<synchronous>, transform_indices = @transform_2, window_bounds = array<i64: 32, 2>}, {transform_indices = @transform_3, window_bounds = array<i64: 2, 32, 256>}]} {
    %c0 = arith.constant 0 : index
    %c0_0 = arith.constant 0 : index
    %c0_1 = arith.constant 0 : index
    %0 = vector.load %arg1[%c0, %c0_0, %c0_1] : memref<2x32x256xf32, #tpu.memory_space<vmem>>, vector<2x32x256xf32>
    %cst = arith.constant dense<0.000000e+00> : vector<2x32xf32>
    %1 = vector.multi_reduction <add>, %0, %cst [2] : vector<2x32x256xf32> to vector<2x32xf32>
    %2 = vector.shape_cast %1 : vector<2x32xf32> to vector<2x32x1xf32>
    %cst_2 = arith.constant 3.906250e-03 : f32
    %3 = vector.broadcast %cst_2 : f32 to vector<2x32x1xf32>
    %4 = arith.mulf %2, %3 : vector<2x32x1xf32>
    %c0_3 = arith.constant 0 : index
    %c0_4 = arith.constant 0 : index
    %5 = vector.load %arg2[%c0_3, %c0_4] : memref<32x2xf32, #tpu.memory_space<vmem>>, vector<32x2xf32>
    %c0_5 = arith.constant 0 : index
    %c0_6 = arith.constant 0 : index
    %6 = vector.load %arg3[%c0_5, %c0_6] : memref<32x2xf32, #tpu.memory_space<vmem>>, vector<32x2xf32>
    %7 = vector.extract_strided_slice %4 {offsets = [0, 0, 0], sizes = [1, 32, 1], strides = [1, 1, 1]} : vector<2x32x1xf32> to vector<1x32x1xf32>
    %8 = vector.shape_cast %7 : vector<1x32x1xf32> to vector<32x1xf32>
    %9 = vector.broadcast %8 : vector<32x1xf32> to vector<32x2xf32>
    %10 = arith.mulf %5, %9 : vector<32x2xf32>
    %cst_7 = arith.constant dense<0.000000e+00> : vector<2xf32>
    %11 = vector.multi_reduction <add>, %10, %cst_7 [0] : vector<32x2xf32> to vector<2xf32>
    %12 = vector.shape_cast %11 : vector<2xf32> to vector<1x2xf32>
    %cst_8 = arith.constant 0.000000e+00 : f32
    %13 = vector.broadcast %cst_8 : f32 to vector<1x2xf32>
    %14 = arith.maximumf %12, %13 : vector<1x2xf32>
    %15 = vector.broadcast %14 : vector<1x2xf32> to vector<32x2xf32>
    %16 = arith.mulf %6, %15 : vector<32x2xf32>
    %cst_9 = arith.constant dense<0.000000e+00> : vector<32xf32>
    %17 = vector.multi_reduction <add>, %16, %cst_9 [1] : vector<32x2xf32> to vector<32xf32>
    %18 = vector.shape_cast %17 : vector<32xf32> to vector<32x1xf32>
    %19 = arith.negf %18 : vector<32x1xf32>
    %20 = math.exp %19 : vector<32x1xf32>
    %cst_10 = arith.constant 1.000000e+00 : f32
    %21 = vector.broadcast %cst_10 : f32 to vector<32x1xf32>
    %22 = arith.addf %21, %20 : vector<32x1xf32>
    %23 = arith.divf %21, %22 : vector<32x1xf32>
    %24 = vector.extract_strided_slice %4 {offsets = [1, 0, 0], sizes = [1, 32, 1], strides = [1, 1, 1]} : vector<2x32x1xf32> to vector<1x32x1xf32>
    %25 = vector.shape_cast %24 : vector<1x32x1xf32> to vector<32x1xf32>
    %26 = vector.broadcast %25 : vector<32x1xf32> to vector<32x2xf32>
    %27 = arith.mulf %5, %26 : vector<32x2xf32>
    %cst_11 = arith.constant dense<0.000000e+00> : vector<2xf32>
    %28 = vector.multi_reduction <add>, %27, %cst_11 [0] : vector<32x2xf32> to vector<2xf32>
    %29 = vector.shape_cast %28 : vector<2xf32> to vector<1x2xf32>
    %cst_12 = arith.constant 0.000000e+00 : f32
    %30 = vector.broadcast %cst_12 : f32 to vector<1x2xf32>
    %31 = arith.maximumf %29, %30 : vector<1x2xf32>
    %32 = vector.broadcast %31 : vector<1x2xf32> to vector<32x2xf32>
    %33 = arith.mulf %6, %32 : vector<32x2xf32>
    %cst_13 = arith.constant dense<0.000000e+00> : vector<32xf32>
    %34 = vector.multi_reduction <add>, %33, %cst_13 [1] : vector<32x2xf32> to vector<32xf32>
    %35 = vector.shape_cast %34 : vector<32xf32> to vector<32x1xf32>
    %36 = arith.negf %35 : vector<32x1xf32>
    %37 = math.exp %36 : vector<32x1xf32>
    %cst_14 = arith.constant 1.000000e+00 : f32
    %38 = vector.broadcast %cst_14 : f32 to vector<32x1xf32>
    %39 = arith.addf %38, %37 : vector<32x1xf32>
    %40 = arith.divf %38, %39 : vector<32x1xf32>
    %41 = vector.shape_cast %23 : vector<32x1xf32> to vector<1x32x1xf32>
    %42 = vector.shape_cast %40 : vector<32x1xf32> to vector<1x32x1xf32>
    %43 = tpu.concatenate %41, %42 in 0 : vector<1x32x1xf32>, vector<1x32x1xf32> -> vector<2x32x1xf32>
    %c0_15 = arith.constant 0 : index
    %c0_16 = arith.constant 0 : index
    %c0_17 = arith.constant 0 : index
    %44 = vector.load %arg1[%c0_15, %c0_16, %c0_17] : memref<2x32x256xf32, #tpu.memory_space<vmem>>, vector<2x32x256xf32>
    %45 = vector.broadcast %43 : vector<2x32x1xf32> to vector<2x32x256xf32>
    %46 = arith.mulf %44, %45 : vector<2x32x256xf32>
    %c0_18 = arith.constant 0 : index
    %c0_19 = arith.constant 0 : index
    %c0_20 = arith.constant 0 : index
    %47 = vector.load %arg4[%c0_18, %c0_19, %c0_20] : memref<2x32x256xf32, #tpu.memory_space<vmem>>, vector<2x32x256xf32>
    tpu.vector_store %arg4[%c0_18, %c0_19, %c0_20], %46 {strides = array<i32>} : memref<2x32x256xf32, #tpu.memory_space<vmem>>, vector<2x32x256xf32>,
    return
  }
  func.func @transform_0(%arg0: i32) -> (i32, i32, i32) {
    %c0_i32 = arith.constant 0 : i32
    %c0_i32_0 = arith.constant 0 : i32
    %c0_i32_1 = arith.constant 0 : i32
    return %arg0, %c0_i32, %c0_i32_0 : i32, i32, i32
  }
  func.func @transform_1(%arg0: i32) -> (i32, i32) {
    %c0_i32 = arith.constant 0 : i32
    %c0_i32_0 = arith.constant 0 : i32
    %c0_i32_1 = arith.constant 0 : i32
    return %c0_i32, %c0_i32_0 : i32, i32
  }
  func.func @transform_2(%arg0: i32) -> (i32, i32) {
    %c0_i32 = arith.constant 0 : i32
    %c0_i32_0 = arith.constant 0 : i32
    %c0_i32_1 = arith.constant 0 : i32
    return %c0_i32, %c0_i32_0 : i32, i32
  }
  func.func @transform_3(%arg0: i32) -> (i32, i32, i32) {
    %c0_i32 = arith.constant 0 : i32
    %c0_i32_0 = arith.constant 0 : i32
    %c0_i32_1 = arith.constant 0 : i32
    return %arg0, %c0_i32, %c0_i32_0 : i32, i32, i32
  }
}

</mosaic_0001>

<bundles_post_ra>
// kernel: tpu_custom_call.1
= control target key start
LH: loop header
LB: loop body
LE: loop exit
PB: predicated region body
PF: predicated region fallthrough
CT: control target
= control target key end

     0   :  { %8 = vsyncpa [#allocation3], 0  ;;  %s523_s0 = inlined_call_operand.hbm [shape: f32[2,32,256], index: 0, kind: input, shape index: {}]   ;;  %s524_s1 = inlined_call_operand.vmem [shape: f32[32,2], index: 1, kind: input, shape index: {}]   ;;  %s525_s2 = inlined_call_operand.vmem [shape: f32[32,2], index: 2, kind: input, shape index: {}]   ;;  %s526_s3 = inlined_call_operand.hbm [shape: f32[2,32,256], index: 3, kind: output, shape index: {}]  }
   0x1   :  { %9 = vsyncpa [#allocation4], 0  ;;  %s382_s12 = smov [#allocation2]  }
   0x2   :  { %s15_s13 = sshll.u32 %s382_s12, 4  ;;  %s16_s13 = int_to_ptr.vmem [resolvable:$true] %s15_s13 }
   0x3   :  { %s346_s14 = scalar_lea.vmem %s16_s13, 2048  ;;  %p351_p1 = scmp.lt.s32.totalorder %s16_s13, %s16_s13 }
   0x4   :  { %p347_p0 = scmp.ne.s32.totalorder %s16_s13, %s346_s14  ;;  %p352_p2 = scmp.lt.s32.totalorder %s346_s14, %s346_s14 }
   0x6   :  { %p353_p3 = por %p352_p2, %p351_p1 }
   0x8   :  { %p354_p4 = pnand %p353_p3, %p347_p0 }
   0xa   :  { %357 = shalt.err (!%p354_p4)
}
   0xb   :  { %s383_s15 = smov 256   ;;  %s384_s16 = smov 16  }
   0xc   :  { %21 = dma.hbm_to_vmem [thread:$0]  %s523_s0, 2048, %s16_s13, [#allocation3], %s383_s15, %s383_s15, %s384_s16  }
   0xd   :  { %378 = dma.done.wait [#allocation3], 2048  }
   0xe   :  { %379 = vsyncadd [#allocation3], 4294965248  ;;  %v413_v0 = vld [vmem:[#allocation2 + $0x40] sm:$0xff]  ;;  %v415_v1 = vld [vmem:[#allocation2 + $0x48] sm:$0xff]  ;;  %vm89_vm0 = vcmask 15360  }
   0xf   :  { %v417_v2 = vld [vmem:[#allocation2] sm:$0xff]  ;;  %v57_v3 = vadd.f32 %v415_v1, %v413_v0  ;;  %v421_v4 = vld [vmem:[#allocation2 + $0x8] sm:$0xff]  ;;  %v423_v5 = vld [vmem:[#allocation2 + $0x50] sm:$0xff] }
  0x10   :  { %v425_v6 = vld [vmem:[#allocation2 + $0x58] sm:$0xff]  ;;  %v45_v7 = vadd.f32 %v421_v4, %v417_v2  ;;  %v429_v8 = vld [vmem:[#allocation2 + $0x10] sm:$0xff]  ;;  %v437_v12 = vld [vmem:[#allocation2 + $0x60] sm:$0xff] }
  0x11   :  { %v431_v9 = vld [vmem:[#allocation2 + $0x18] sm:$0xff]  ;;  %58 = vadd.xlane.f32.xlu1 %v57_v3  ;;  %v60_v10 = vadd.f32 %v425_v6, %v423_v5  ;;  %v439_v13 = vld [vmem:[#allocation2 + $0x68] sm:$0xff]  ;;  %v441_v14 = vld [vmem:[#allocation2 + $0x20] sm:$0xff] }
  0x12   :  { %46 = vadd.xlane.f32.xlu0 %v45_v7  ;;  %v48_v11 = vadd.f32 %v431_v9, %v429_v8  ;;  %v443_v15 = vld [vmem:[#allocation2 + $0x28] sm:$0xff]  ;;  %v63_v16 = vadd.f32 %v439_v13, %v437_v12  ;;  %v449_v18 = vld [vmem:[#allocation2 + $0x70] sm:$0xff]  ;;  %v451_v19 = vld [vmem:[#allocation2 + $0x78] sm:$0xff] }
  0x13   :  { %v51_v17 = vadd.f32 %v443_v15, %v441_v14  ;;  %v453_v20 = vld [vmem:[#allocation2 + $0x30] sm:$0xff]  ;;  %v455_v21 = vld [vmem:[#allocation2 + $0x38] sm:$0xff]  ;;  %v66_v22 = vadd.f32 %v451_v19, %v449_v18  ;;  %v77_v27 = vld [vmem:[%s524_s1] sm:$0xff] }
  0x14   :  { %v54_v23 = vadd.f32 %v455_v21, %v453_v20  ;;  %v78_v30 = vld [vmem:[%s524_s1 + $0x8] sm:$0xff]  ;;  %v79_v40 = vld [vmem:[%s524_s1 + $0x10] sm:$0xff]  ;;  %v80_v49 = vld [vmem:[%s524_s1 + $0x18] sm:$0xff] }
  0x15   :  { %61 = vadd.xlane.f32.xlu1 %v60_v10 }
  0x16   :  { %49 = vadd.xlane.f32.xlu0 %v48_v11 }
  0x19   :  { %64 = vadd.xlane.f32.xlu1 %v63_v16 }
  0x1a   :  { %52 = vadd.xlane.f32.xlu0 %v51_v17 }
  0x1d   :  { %67 = vadd.xlane.f32.xlu1 %v66_v22 }
  0x1e   :  { %55 = vadd.xlane.f32.xlu0 %v54_v23 }
  0x9a   :  { %v59_v24 = vpop.xlane.xlu1 %58 }
  0x9b   :  { %v73_v25 = vmul.f32 0.00390625, %v59_v24  ;;  %v47_v26 = vpop.xlane.xlu0 %46 }
  0x9c   :  { %v69_v33 = vmul.f32 0.00390625, %v47_v26 }
  0x9d   :  { %v144_v28 = vmul.f32 %v77_v27, %v73_v25 }
  0x9e   :  { %v62_v29 = vpop.xlane.xlu1 %61  ;;  %v85_v43 = vmul.f32 %v77_v27, %v69_v33  ;;  %v84_v33 = vld [vmem:[%s525_s2 + $0x18] sm:$0xff] }
  0x9f   :  { %v74_v31 = vmul.f32 0.00390625, %v62_v29  ;;  %v50_v32 = vpop.xlane.xlu0 %49  ;;  %v148_v35 = vsel %vm89_vm0, %v144_v28, 0.0  ;;  %v82_v29 = vld [vmem:[%s525_s2 + $0x8] sm:$0xff] }
  0xa0   :  { %v70_v34 = vmul.f32 0.00390625, %v50_v32  ;;  %v90_v54 = vsel %vm89_vm0, %v85_v43, 0.0 }
  0xa1   :  { %v145_v36 = vmul.f32 %v78_v30, %v74_v31 }
  0xa2   :  { %v86_v37 = vmul.f32 %v78_v30, %v70_v34  ;;  %v65_v38 = vpop.xlane.xlu1 %64  ;;  %v81_v30 = vld [vmem:[%s525_s2] sm:$0xff]  ;;  %v83_v34 = vld [vmem:[%s525_s2 + $0x10] sm:$0xff]  ;;  %s386_s2 = smov [#allocation5]  }
  0xa3   :  { %v149_v39 = vsel %vm89_vm0, %v145_v36, 0.0  ;;  %v75_v41 = vmul.f32 0.00390625, %v65_v38  ;;  %v53_v42 = vpop.xlane.xlu0 %52  ;;  %s279_s6 = sshll.u32 %s386_s2, 4  ;;  %s280_s6 = int_to_ptr.vmem [resolvable:$true] %s279_s6 }
  0xa4   :  { %v150_v44 = vadd.f32 %v149_v39, %v148_v35  ;;  %v71_v45 = vmul.f32 0.00390625, %v53_v42  ;;  %v91_v47 = vsel %vm89_vm0, %v86_v37, 0.0  ;;  %s358_s7 = scalar_lea.vmem %s280_s6, 2048  ;;  %p363_p6 = scmp.lt.s32.totalorder %s280_s6, %s280_s6 }
  0xa5   :  { %v146_v46 = vmul.f32 %v79_v40, %v75_v41  ;;  %v92_v58 = vadd.f32 %v91_v47, %v90_v54  ;;  %p359_p5 = scmp.ne.s32.totalorder %s280_s6, %s358_s7  ;;  %p364_p7 = scmp.lt.s32.totalorder %s358_s7, %s358_s7 }
  0xa6   :  { %v87_v48 = vmul.f32 %v79_v40, %v71_v45  ;;  %v68_v50 = vpop.xlane.xlu1 %67 }
  0xa7   :  { %v151_v51 = vsel %vm89_vm0, %v146_v46, 0.0  ;;  %v76_v52 = vmul.f32 0.00390625, %v68_v50  ;;  %v56_v53 = vpop.xlane.xlu0 %55  ;;  %p365_p8 = por %p364_p7, %p363_p6 }
  0xa8   :  { %v152_v55 = vadd.f32 %v151_v51, %v150_v44  ;;  %v93_v56 = vsel %vm89_vm0, %v87_v48, 0.0  ;;  %v72_v57 = vmul.f32 0.00390625, %v56_v53 }
  0xa9   :  { %v147_v59 = vmul.f32 %v80_v49, %v76_v52  ;;  %v94_v61 = vadd.f32 %v93_v56, %v92_v58  ;;  %v385_v52 = vmov 0   ;;  %p366_p9 = pnand %p365_p8, %p359_p5 }
  0xaa   :  { %v88_v60 = vmul.f32 %v80_v49, %v72_v57  ;;  %305 = vset.pattern.permute.xlu1 %v385_v52  ;;  %304 = vset.pattern.permute.xlu0 %v385_v52 }
  0xab   :  { %v153_v62 = vsel %vm89_vm0, %v147_v59, 0.0 }
  0xac   :  { %v154_v63 = vadd.f32 %v153_v62, %v152_v55  ;;  %v95_v3 = vsel %vm89_vm0, %v88_v60, 0.0 }
  0xad   :  { %v96_v7 = vadd.f32 %v95_v3, %v94_v61 }
  0xae   :  { %v155_v10 = vrot.slane %v154_v63, 4 }
  0xaf   :  { %v97_v11 = vrot.slane %v96_v7, 4 }
  0xb0   :  { %v156_v16 = vadd.f32 %v155_v10, %v154_v63 }
  0xb1   :  { %v98_v17 = vadd.f32 %v97_v11, %v96_v7 }
  0xb2   :  { %v157_v22 = vrot.slane %v156_v16, 2 }
  0xb3   :  { %v99_v23 = vrot.slane %v98_v17, 2 }
  0xb4   :  { %v158_v24 = vadd.f32 %v157_v22, %v156_v16 }
  0xb5   :  { %v100_v25 = vadd.f32 %v99_v23, %v98_v17 }
  0xb6   :  { %v159_v26 = vrot.slane %v158_v24, 1 }
  0xb7   :  { %v101_v27 = vrot.slane %v100_v25, 1 }
  0xb8   :  { %v160_v31 = vadd.f32 %v159_v26, %v158_v24 }
  0xb9   :  { %v102_v28 = vadd.f32 %v101_v27, %v100_v25 }
  0xba   :  { %v161_v37 = vmax.f32 %v160_v31, 0.0 }
  0xbb   :  { %v103_v32 = vmax.f32 %v102_v28, 0.0 }
  0xbc   :  { %v163_v44 = vmul.f32 %v161_v37, %v82_v29  ;;  %v162_v45 = vmul.f32 %v161_v37, %v81_v30  ;;  %v165_v48 = vmul.f32 %v161_v37, %v84_v33  ;;  %v164_v49 = vmul.f32 %v161_v37, %v83_v34 }
  0xbd   :  { %v105_v35 = vmul.f32 %v103_v32, %v82_v29  ;;  %v104_v36 = vmul.f32 %v103_v32, %v81_v30  ;;  %v107_v40 = vmul.f32 %v103_v32, %v84_v33  ;;  %v106_v41 = vmul.f32 %v103_v32, %v83_v34 }
  0xbe   :  { %v169_v46 = vsel %vm89_vm0, %v163_v44, 0.0  ;;  %v166_v47 = vsel %vm89_vm0, %v162_v45, 0.0  ;;  %v175_v50 = vsel %vm89_vm0, %v165_v48, 0.0  ;;  %v172_v51 = vsel %vm89_vm0, %v164_v49, 0.0 }
  0xbf   :  { %v111_v38 = vsel %vm89_vm0, %v105_v35, 0.0  ;;  %v108_v39 = vsel %vm89_vm0, %v104_v36, 0.0  ;;  %v117_v42 = vsel %vm89_vm0, %v107_v40, 0.0  ;;  %v114_v43 = vsel %vm89_vm0, %v106_v41, 0.0 }
  0xc0   :  { %112 = vadd.xlane.f32.xlu1 %v111_v38  ;;  %109 = vadd.xlane.f32.xlu0 %v108_v39 }
  0xc4   :  { %118 = vadd.xlane.f32.xlu1 %v117_v42  ;;  %115 = vadd.xlane.f32.xlu0 %v114_v43 }
  0xc8   :  { %170 = vadd.xlane.f32.xlu1 %v169_v46  ;;  %167 = vadd.xlane.f32.xlu0 %v166_v47 }
  0xcc   :  { %176 = vadd.xlane.f32.xlu1 %v175_v50  ;;  %173 = vadd.xlane.f32.xlu0 %v172_v51 }
 0x149   :  { %v113_v53 = vpop.xlane.xlu1 %112  ;;  %v110_v54 = vpop.xlane.xlu0 %109 }
 0x14a   :  { %v292_v55 = vmul.f32 -1.442695, %v113_v53  ;;  %v291_v56 = vmul.f32 -1.442695, %v110_v54 }
 0x14c   :  { %306 = vpow2.f32 %v292_v55 }
 0x14d   :  { %308 = vpow2.f32 %v291_v56  ;;  %v119_v57 = vpop.xlane.xlu1 %118  ;;  %v116_v58 = vpop.xlane.xlu0 %115 }
 0x14e   :  { %v294_v59 = vmul.f32 -1.442695, %v119_v57  ;;  %v293_v60 = vmul.f32 -1.442695, %v116_v58 }
 0x150   :  { %310 = vpow2.f32 %v294_v59 }
 0x151   :  { %312 = vpow2.f32 %v293_v60  ;;  %v168_v61 = vpop.xlane.xlu0 %167  ;;  %v171_v62 = vpop.xlane.xlu1 %170 }
 0x152   :  { %v295_v63 = vmul.f32 -1.442695, %v168_v61  ;;  %v296_v3 = vmul.f32 -1.442695, %v171_v62 }
 0x154   :  { %314 = vpow2.f32 %v295_v63 }
 0x155   :  { %v174_v7 = vpop.xlane.xlu0 %173  ;;  %316 = vpow2.f32 %v296_v3  ;;  %v177_v16 = vpop.xlane.xlu1 %176 }
 0x156   :  { %v297_v10 = vmul.f32 -1.442695, %v174_v7  ;;  %v298_v24 = vmul.f32 -1.442695, %v177_v16 }
 0x158   :  { %318 = vpow2.f32 %v297_v10 }
 0x159   :  { %v307_v11 = vpop.eup %306 }
 0x15a   :  { %v309_v17 = vpop.eup %308  ;;  %v133_v22 = vadd.f32 1.0, %v307_v11 }
 0x15b   :  { %v132_v23 = vadd.f32 1.0, %v309_v17 }
 0x15c   :  { %320 = vrcp.f32 %v133_v22 }
 0x15d   :  { %v311_v25 = vpop.eup %310  ;;  %322 = vrcp.f32 %v132_v23 }
 0x15e   :  { %v313_v26 = vpop.eup %312  ;;  %324 = vpow2.f32 %v298_v24  ;;  %v135_v28 = vadd.f32 1.0, %v311_v25 }
 0x15f   :  { %v134_v27 = vadd.f32 1.0, %v313_v26 }
 0x161   :  { %326 = vrcp.f32 %v134_v27  ;;  %v315_v29 = vpop.eup %314 }
 0x162   :  { %328 = vrcp.f32 %v135_v28  ;;  %v190_v30 = vadd.f32 1.0, %v315_v29  ;;  %v317_v31 = vpop.eup %316 }
 0x163   :  { %v191_v34 = vadd.f32 1.0, %v317_v31 }
 0x164   :  { %330 = vrcp.f32 %v190_v30 }
 0x165   :  { %v319_v32 = vpop.eup %318  ;;  %332 = vrcp.f32 %v191_v34 }
 0x166   :  { %v192_v37 = vadd.f32 1.0, %v319_v32 }
 0x168   :  { %334 = vrcp.f32 %v192_v37 }
 0x169   :  { %v321_v33 = vpop.eup %320 }
 0x16a   :  { %v323_v35 = vpop.eup %322  ;;  %209 = vperm.xlu1 %305, %v321_v33  }
 0x16b   :  { %204 = vperm.xlu0 %304, %v323_v35   ;;  %v325_v36 = vpop.eup %324 }
 0x16c   :  { %v193_v39 = vadd.f32 1.0, %v325_v36 }
 0x16e   :  { %v327_v38 = vpop.eup %326  ;;  %336 = vrcp.f32 %v193_v39 }
 0x16f   :  { %214 = vperm.xlu1 %305, %v327_v38   ;;  %v329_v40 = vpop.eup %328 }
 0x171   :  { %v331_v41 = vpop.eup %330 }
 0x172   :  { %v333_v42 = vpop.eup %332 }
 0x173   :  { %219 = vperm.xlu1 %305, %v329_v40  }
 0x175   :  { %v335_v43 = vpop.eup %334 }
 0x177   :  { %224 = vperm.xlu1 %305, %v331_v41  }
 0x17b   :  { %229 = vperm.xlu1 %305, %v333_v42   ;;  %v337_v44 = vpop.eup %336 }
 0x17f   :  { %234 = vperm.xlu1 %305, %v335_v43  }
 0x183   :  { %239 = vperm.xlu1 %305, %v337_v44  }
 0x1e5   :  { %v210_v45 = vpop.permute.xlu1 %209 }
 0x1e6   :  { %v244_v46 = vmul.f32 %v210_v45, %v429_v8  ;;  %v245_v47 = vmul.f32 %v210_v45, %v431_v9  ;;  %v205_v48 = vpop.permute.xlu0 %204 }
 0x1e7   :  { %v242_v49 = vmul.f32 %v205_v48, %v417_v2  ;;  %v243_v50 = vmul.f32 %v205_v48, %v421_v4 }
 0x1e8   :  { %260 = vst [vmem:[#allocation5 + $0x10] sm:$0xff] %v244_v46  ;;  %261 = vst [vmem:[#allocation5 + $0x18] sm:$0xff] %v245_v47 }
 0x1e9   :  { %258 = vst [vmem:[#allocation5] sm:$0xff] %v242_v49  ;;  %259 = vst [vmem:[#allocation5 + $0x8] sm:$0xff] %v243_v50 }
 0x1ea   :  { %v215_v51 = vpop.permute.xlu1 %214 }
 0x1eb   :  { %v246_v52 = vmul.f32 %v215_v51, %v441_v14  ;;  %v247_v53 = vmul.f32 %v215_v51, %v443_v15 }
 0x1ed   :  { %262 = vst [vmem:[#allocation5 + $0x20] sm:$0xff] %v246_v52  ;;  %263 = vst [vmem:[#allocation5 + $0x28] sm:$0xff] %v247_v53 }
 0x1ee   :  { %v220_v54 = vpop.permute.xlu1 %219 }
 0x1ef   :  { %v248_v8 = vmul.f32 %v220_v54, %v453_v20  ;;  %v249_v9 = vmul.f32 %v220_v54, %v455_v21 }
 0x1f1   :  { %264 = vst [vmem:[#allocation5 + $0x30] sm:$0xff] %v248_v8  ;;  %265 = vst [vmem:[#allocation5 + $0x38] sm:$0xff] %v249_v9 }
 0x1f2   :  { %v225_v2 = vpop.permute.xlu1 %224 }
 0x1f3   :  { %v250_v4 = vmul.f32 %v225_v2, %v413_v0  ;;  %v251_v55 = vmul.f32 %v225_v2, %v415_v1 }
 0x1f5   :  { %266 = vst [vmem:[#allocation5 + $0x40] sm:$0xff] %v250_v4  ;;  %267 = vst [vmem:[#allocation5 + $0x48] sm:$0xff] %v251_v55 }
 0x1f6   :  { %v230_v56 = vpop.permute.xlu1 %229 }
 0x1f7   :  { %v252_v14 = vmul.f32 %v230_v56, %v423_v5  ;;  %v253_v15 = vmul.f32 %v230_v56, %v425_v6 }
 0x1f9   :  { %268 = vst [vmem:[#allocation5 + $0x50] sm:$0xff] %v252_v14  ;;  %269 = vst [vmem:[#allocation5 + $0x58] sm:$0xff] %v253_v15 }
 0x1fa   :  { %v235_v57 = vpop.permute.xlu1 %234 }
 0x1fb   :  { %v254_v20 = vmul.f32 %v235_v57, %v437_v12  ;;  %v255_v21 = vmul.f32 %v235_v57, %v439_v13 }
 0x1fd   :  { %270 = vst [vmem:[#allocation5 + $0x60] sm:$0xff] %v254_v20  ;;  %271 = vst [vmem:[#allocation5 + $0x68] sm:$0xff] %v255_v21 }
 0x1fe   :  { %v240_v0 = vpop.permute.xlu1 %239 }
 0x1ff   :  { %v256_v1 = vmul.f32 %v240_v0, %v449_v18  ;;  %v257_v58 = vmul.f32 %v240_v0, %v451_v19 }
 0x201   :  { %272 = vst [vmem:[#allocation5 + $0x70] sm:$0xff] %v256_v1  ;;  %273 = vst [vmem:[#allocation5 + $0x78] sm:$0xff] %v257_v58 }
 0x202   :  { %369 = shalt.err (!%p366_p9)
}
 0x203   :  { %285 = dma.vmem_to_hbm [thread:$0]  %s280_s6, 2048, %s526_s3, [#allocation4], %s383_s15, %s383_s15, %s384_s16  }
 0x204   :  { %380 = dma.done.wait [#allocation4], 2048  }
 0x205   :  { %381 = vsyncadd [#allocation4], 4294965248 }
 0x206   :  { %289 = vsyncpa [#allocation3], 1 }
 0x207   :  { %290 = vsyncpa [#allocation4], 1 }

</bundles_post_ra>
